<compile_context>
chip_gen: v5e
topology: v5e:2x2
jax: 0.10.0
libtpu: 0.0.40
codegen_flags: <defaults>
</compile_context>

<pallas_src>
import functools

import jax
import jax.numpy as jnp
from jax.experimental import pallas as pl
from jax.experimental.pallas import tpu as pltpu


def _residual_kernel(seed_ref, x_ref, w_ref, b_ref, alpha_ref, beta_ref, o_ref,
                     *, eps, p, training, tile_rows):
    x = x_ref[...].astype(jnp.float32)                        # [TM, F]
    f = x.shape[-1]

    # --- LayerNormalization (torch semantics: unbiased std, std + eps) ---
    mean = jnp.mean(x, axis=-1, keepdims=True)                # [TM, 1]
    diff = x - mean
    var_unbiased = jnp.sum(diff * diff, axis=-1, keepdims=True) * (1.0 / (f - 1))
    inv = 1.0 / (jnp.sqrt(var_unbiased) + eps)                # per-row reciprocal
    normed = (alpha_ref[...].astype(jnp.float32) * (diff * inv)
              + beta_ref[...].astype(jnp.float32))

    # --- sublayer: Linear(F, F) on the MXU (bf16 operands, f32 accumulate) ---
    y = jnp.dot(normed.astype(jnp.bfloat16),
                w_ref[...].astype(jnp.bfloat16),
                preferred_element_type=jnp.float32)
    y = y + b_ref[...].astype(jnp.float32)

    # --- Dropout (keep if hash(global_idx, seed) >= p * 2^32, scale by 1/(1-p)) ---
    if training and p > 0.0:
        rows = (jax.lax.broadcasted_iota(jnp.int32, y.shape, 0)
                + pl.program_id(0) * tile_rows)               # global token index
        cols = jax.lax.broadcasted_iota(jnp.int32, y.shape, 1)
        idx = (rows * f + cols).astype(jnp.uint32)
        h = idx ^ (seed_ref[0].astype(jnp.uint32) * jnp.uint32(0x9E3779B9))
        h = (h ^ (h >> jnp.uint32(16))) * jnp.uint32(0x85EBCA6B)
        h = (h ^ (h >> jnp.uint32(13))) * jnp.uint32(0xC2B2AE35)
        h = h ^ (h >> jnp.uint32(16))
        thresh = jnp.uint32(min(int(round(p * 4294967296.0)), 0xFFFFFFFF))
        scale = jnp.float32(1.0 / (1.0 - p))
        y = y * jnp.where(h >= thresh, scale, jnp.float32(0.0))

    # --- residual add ---
    o_ref[...] = (x + y).astype(o_ref.dtype)


def _pick_tile_rows(t):
    for tm in (512, 256, 128, 64, 32, 16, 8):
        if t % tm == 0:
            return tm
    return t


def _resident_spec(shape):
    """Grid-invariant operand: constant index_map, single-buffered if possible."""
    index_map = lambda i, seed: (0,) * len(shape)
    if hasattr(pl, "Buffered"):
        try:
            return pl.BlockSpec(shape, index_map, pipeline_mode=pl.Buffered(1))
        except (TypeError, ValueError):
            pass
    return pl.BlockSpec(shape, index_map)


def residual_connection(x, w, b, alpha, beta, *, seed=0, eps=1e-6, p=0.1,
                        training=True, tile_tokens=None):
    """x: [B, S, F]; sublayer = Linear(w, b); returns x + dropout(linear(norm(x)))."""
    B, S, F = x.shape
    T = B * S
    x2 = x.reshape(T, F)
    b2 = b.reshape(1, F)
    alpha2 = alpha.reshape(1, F)
    beta2 = beta.reshape(1, F)
    seed_arr = jnp.asarray([seed], dtype=jnp.int32)

    tm = tile_tokens if tile_tokens is not None else _pick_tile_rows(T)
    assert T % tm == 0, f"token tile {tm} must divide T={T}"
    grid = (T // tm,)

    # VMEM budget: double-buffered x/out tiles + (at most) double-buffered
    # resident weight + small vectors + slack.  Capped at 64 MiB (v7x-safe).
    need = (2 * 2 * tm * F * x.dtype.itemsize
            + 2 * F * F * w.dtype.itemsize
            + 3 * 2 * F * 4
            + (2 << 20))
    vmem_limit = int(min(max(need, 8 << 20), 64 << 20))

    kernel = functools.partial(_residual_kernel, eps=eps, p=p,
                               training=training, tile_rows=tm)

    out2 = pl.pallas_call(
        kernel,
        out_shape=jax.ShapeDtypeStruct((T, F), x.dtype),
        grid_spec=pltpu.PrefetchScalarGridSpec(
            num_scalar_prefetch=1,
            grid=grid,
            in_specs=[
                pl.BlockSpec((tm, F), lambda i, seed: (i, 0)),   # x (tiled over tokens)
                _resident_spec((F, F)),                          # w  (resident)
                _resident_spec((1, F)),                          # b
                _resident_spec((1, F)),                          # alpha
                _resident_spec((1, F)),                          # beta
            ],
            out_specs=pl.BlockSpec((tm, F), lambda i, seed: (i, 0)),
        ),
        compiler_params=pltpu.CompilerParams(
            dimension_semantics=("parallel",),
            vmem_limit_bytes=vmem_limit),
    )(seed_arr, x2, w, b2, alpha2, beta2)

    return out2.reshape(B, S, F)


if __name__ == "__main__":
    B, S, F = 2, 8, 128
    key = jax.random.PRNGKey(0)
    kx, kw = jax.random.split(key)

    x = jax.random.normal(kx, (B, S, F), dtype=jnp.float32)
    alpha = jnp.ones((F,), dtype=jnp.float32)
    beta = jnp.zeros((F,), dtype=jnp.float32)
    # TODO(synk): `sublayer` is an arbitrary callable in the PyTorch module;
    # it is instantiated here as a deterministic Linear(F -> F) so it can fuse.
    w = 0.02 * jax.random.normal(kw, (F, F), dtype=jnp.float32)
    b = jnp.zeros((F,), dtype=jnp.float32)

    # Training path (dropout active).
    out = residual_connection(x, w, b, alpha, beta, seed=0, p=0.1, training=True)
    jax.block_until_ready(out)
    assert out.shape == (B, S, F)

    # Eval path vs pure-JAX reference (matmul operands rounded to bf16 like the kernel).
    out_eval = residual_connection(x, w, b, alpha, beta, p=0.1, training=False)
    jax.block_until_ready(out_eval)
    normed_ref = alpha * (x - x.mean(-1, keepdims=True)) / (
        jnp.std(x, axis=-1, keepdims=True, ddof=1) + 1e-6) + beta
    ref = x + jnp.einsum(
        "bsf,fg->bsg",
        normed_ref.astype(jnp.bfloat16).astype(jnp.float32),
        w.astype(jnp.bfloat16).astype(jnp.float32)) + b
    assert jnp.allclose(out_eval, ref, atol=3e-2, rtol=3e-2)

    # Dropout mask hashes the GLOBAL element index -> result is tiling-invariant.
    out_small_tiles = residual_connection(x, w, b, alpha, beta, seed=0, p=0.1,
                                          training=True, tile_tokens=8)
    jax.block_until_ready(out_small_tiles)
    assert jnp.allclose(out, out_small_tiles, atol=1e-5, rtol=1e-5)

    # Some (but not all) elements were dropped (dropped element -> out == x exactly).
    drop_frac = float(jnp.mean((out == x).astype(jnp.float32)))
    assert 0.0 < drop_frac < 0.5, drop_frac

    print("KERNEL_OK")
</pallas_src>

<mosaic_0001>
module attributes {stable_mosaic.version = 11 : i64} {
  func.func @_residual_kernel(%arg0: i32, %arg1: memref<1xi32, #tpu.memory_space<smem>>, %arg2: memref<16x128xf32, #tpu.memory_space<vmem>>, %arg3: memref<128x128xf32, #tpu.memory_space<vmem>>, %arg4: memref<1x128xf32, #tpu.memory_space<vmem>>, %arg5: memref<1x128xf32, #tpu.memory_space<vmem>>, %arg6: memref<1x128xf32, #tpu.memory_space<vmem>>, %arg7: memref<16x128xf32, #tpu.memory_space<vmem>>) attributes {dimension_semantics = [#tpu.dimension_semantics<parallel>], iteration_bounds = array<i64: 1>, scalar_prefetch = 1 : i64, scratch_operands = 0 : i64, tpu.core_type = #tpu.core_type<tc>, window_params = [{transform_indices = @transform_0, window_bounds = array<i64: 16, 128>}, {pipeline_mode = #tpu.pipeline_mode<synchronous>, transform_indices = @transform_1, window_bounds = array<i64: 128, 128>}, {pipeline_mode = #tpu.pipeline_mode<synchronous>, transform_indices = @transform_2, window_bounds = array<i64: 1, 128>}, {pipeline_mode = #tpu.pipeline_mode<synchronous>, transform_indices = @transform_3, window_bounds = array<i64: 1, 128>}, {pipeline_mode = #tpu.pipeline_mode<synchronous>, transform_indices = @transform_4, window_bounds = array<i64: 1, 128>}, {transform_indices = @transform_5, window_bounds = array<i64: 16, 128>}]} {
    %c0 = arith.constant 0 : index
    %c0_0 = arith.constant 0 : index
    %0 = vector.load %arg2[%c0, %c0_0] : memref<16x128xf32, #tpu.memory_space<vmem>>, vector<16x128xf32>
    %cst = arith.constant dense<0.000000e+00> : vector<16xf32>
    %1 = vector.multi_reduction <add>, %0, %cst [1] : vector<16x128xf32> to vector<16xf32>
    %2 = vector.shape_cast %1 : vector<16xf32> to vector<16x1xf32>
    %cst_1 = arith.constant 1.280000e+02 : f32
    %3 = vector.broadcast %cst_1 : f32 to vector<16x1xf32>
    %4 = arith.divf %2, %3 : vector<16x1xf32>
    %5 = vector.broadcast %4 : vector<16x1xf32> to vector<16x128xf32>
    %6 = arith.subf %0, %5 : vector<16x128xf32>
    %7 = arith.mulf %6, %6 : vector<16x128xf32>
    %cst_2 = arith.constant dense<0.000000e+00> : vector<16xf32>
    %8 = vector.multi_reduction <add>, %7, %cst_2 [1] : vector<16x128xf32> to vector<16xf32>
    %9 = vector.shape_cast %8 : vector<16xf32> to vector<16x1xf32>
    %cst_3 = arith.constant 0.00787401571 : f32
    %10 = vector.broadcast %cst_3 : f32 to vector<16x1xf32>
    %11 = arith.mulf %9, %10 : vector<16x1xf32>
    %12 = math.sqrt %11 : vector<16x1xf32>
    %cst_4 = arith.constant 9.99999997E-7 : f32
    %13 = vector.broadcast %cst_4 : f32 to vector<16x1xf32>
    %14 = arith.addf %12, %13 : vector<16x1xf32>
    %cst_5 = arith.constant 1.000000e+00 : f32
    %15 = vector.broadcast %cst_5 : f32 to vector<16x1xf32>
    %16 = arith.divf %15, %14 : vector<16x1xf32>
    %c0_6 = arith.constant 0 : index
    %c0_7 = arith.constant 0 : index
    %17 = vector.load %arg5[%c0_6, %c0_7] : memref<1x128xf32, #tpu.memory_space<vmem>>, vector<1x128xf32>
    %18 = vector.broadcast %16 : vector<16x1xf32> to vector<16x128xf32>
    %19 = arith.mulf %6, %18 : vector<16x128xf32>
    %20 = vector.broadcast %17 : vector<1x128xf32> to vector<16x128xf32>
    %21 = arith.mulf %20, %19 : vector<16x128xf32>
    %c0_8 = arith.constant 0 : index
    %c0_9 = arith.constant 0 : index
    %22 = vector.load %arg6[%c0_8, %c0_9] : memref<1x128xf32, #tpu.memory_space<vmem>>, vector<1x128xf32>
    %23 = vector.broadcast %22 : vector<1x128xf32> to vector<16x128xf32>
    %24 = arith.addf %21, %23 : vector<16x128xf32>
    %25 = arith.truncf %24 : vector<16x128xf32> to vector<16x128xbf16>
    %c0_10 = arith.constant 0 : index
    %c0_11 = arith.constant 0 : index
    %26 = vector.load %arg3[%c0_10, %c0_11] : memref<128x128xf32, #tpu.memory_space<vmem>>, vector<128x128xf32>
    %27 = arith.truncf %26 : vector<128x128xf32> to vector<128x128xbf16>
    %cst_12 = arith.constant dense<0.000000e+00> : vector<16x128xf32>
    %28 = tpu.matmul %25, %27, %cst_12 {dimension_numbers = #tpu.dot_dimension_numbers<[1], [0], [0], [1], [0, 0, 1, 1], [], []>} : vector<16x128xbf16>, vector<128x128xbf16>, vector<16x128xf32> -> vector<16x128xf32>
    %c0_13 = arith.constant 0 : index
    %c0_14 = arith.constant 0 : index
    %29 = vector.load %arg4[%c0_13, %c0_14] : memref<1x128xf32, #tpu.memory_space<vmem>>, vector<1x128xf32>
    %30 = vector.broadcast %29 : vector<1x128xf32> to vector<16x128xf32>
    %31 = arith.addf %28, %30 : vector<16x128xf32>
    %32 = tpu.iota {dimensions = array<i32: 0>} : vector<16x128xi32>
    %c16_i32 = arith.constant 16 : i32
    %33 = arith.muli %arg0, %c16_i32 : i32
    %34 = vector.broadcast %33 : i32 to vector<16x128xi32>
    %35 = arith.addi %32, %34 : vector<16x128xi32>
    %36 = tpu.iota {dimensions = array<i32: 1>} : vector<16x128xi32>
    %c128_i32 = arith.constant 128 : i32
    %37 = vector.broadcast %c128_i32 : i32 to vector<16x128xi32>
    %38 = arith.muli %35, %37 : vector<16x128xi32>
    %39 = arith.addi %38, %36 : vector<16x128xi32>
    %c0_15 = arith.constant 0 : index
    %40 = memref.load %arg1[%c0_15] : memref<1xi32, #tpu.memory_space<smem>>
    %c-1640531527_i32 = arith.constant -1640531527 : i32
    %41 = arith.muli %40, %c-1640531527_i32 : i32
    %42 = vector.broadcast %41 : i32 to vector<16x128xi32>
    %43 = arith.xori %39, %42 : vector<16x128xi32>
    %c16_i32_16 = arith.constant 16 : i32
    %44 = vector.broadcast %c16_i32_16 : i32 to vector<16x128xi32>
    %45 = arith.shrui %43, %44 : vector<16x128xi32>
    %46 = arith.xori %43, %45 : vector<16x128xi32>
    %c-2048144789_i32 = arith.constant -2048144789 : i32
    %47 = vector.broadcast %c-2048144789_i32 : i32 to vector<16x128xi32>
    %48 = arith.muli %46, %47 : vector<16x128xi32>
    %c13_i32 = arith.constant 13 : i32
    %49 = vector.broadcast %c13_i32 : i32 to vector<16x128xi32>
    %50 = arith.shrui %48, %49 : vector<16x128xi32>
    %51 = arith.xori %48, %50 : vector<16x128xi32>
    %c-1028477387_i32 = arith.constant -1028477387 : i32
    %52 = vector.broadcast %c-1028477387_i32 : i32 to vector<16x128xi32>
    %53 = arith.muli %51, %52 : vector<16x128xi32>
    %c16_i32_17 = arith.constant 16 : i32
    %54 = vector.broadcast %c16_i32_17 : i32 to vector<16x128xi32>
    %55 = arith.shrui %53, %54 : vector<16x128xi32>
    %56 = arith.xori %53, %55 : vector<16x128xi32>
    %c429496730_i32 = arith.constant 429496730 : i32
    %57 = vector.broadcast %c429496730_i32 : i32 to vector<16x128xi32>
    %58 = arith.cmpi uge, %56, %57 : vector<16x128xi32>
    %cst_18 = arith.constant 1.11111116 : f32
    %cst_19 = arith.constant 0.000000e+00 : f32
    %59 = vector.broadcast %cst_18 : f32 to vector<16x128xf32>
    %60 = vector.broadcast %cst_19 : f32 to vector<16x128xf32>
    %61 = arith.select %58, %59, %60 : vector<16x128xi1>, vector<16x128xf32>
    %62 = arith.mulf %31, %61 : vector<16x128xf32>
    %63 = arith.addf %0, %62 : vector<16x128xf32>
    %c0_20 = arith.constant 0 : index
    %c0_21 = arith.constant 0 : index
    %64 = vector.load %arg7[%c0_20, %c0_21] : memref<16x128xf32, #tpu.memory_space<vmem>>, vector<16x128xf32>
    tpu.vector_store %arg7[%c0_20, %c0_21], %63 {strides = array<i32>} : memref<16x128xf32, #tpu.memory_space<vmem>>, vector<16x128xf32>,
    return
  }
  func.func @transform_0(%arg0: i32, %arg1: memref<1xi32, #tpu.memory_space<smem>>) -> (i32, i32) {
    %c0_i32 = arith.constant 0 : i32
    %c0_i32_0 = arith.constant 0 : i32
    return %arg0, %c0_i32 : i32, i32
  }
  func.func @transform_1(%arg0: i32, %arg1: memref<1xi32, #tpu.memory_space<smem>>) -> (i32, i32) {
    %c0_i32 = arith.constant 0 : i32
    %c0_i32_0 = arith.constant 0 : i32
    %c0_i32_1 = arith.constant 0 : i32
    return %c0_i32, %c0_i32_0 : i32, i32
  }
  func.func @transform_2(%arg0: i32, %arg1: memref<1xi32, #tpu.memory_space<smem>>) -> (i32, i32) {
    %c0_i32 = arith.constant 0 : i32
    %c0_i32_0 = arith.constant 0 : i32
    %c0_i32_1 = arith.constant 0 : i32
    return %c0_i32, %c0_i32_0 : i32, i32
  }
  func.func @transform_3(%arg0: i32, %arg1: memref<1xi32, #tpu.memory_space<smem>>) -> (i32, i32) {
    %c0_i32 = arith.constant 0 : i32
    %c0_i32_0 = arith.constant 0 : i32
    %c0_i32_1 = arith.constant 0 : i32
    return %c0_i32, %c0_i32_0 : i32, i32
  }
  func.func @transform_4(%arg0: i32, %arg1: memref<1xi32, #tpu.memory_space<smem>>) -> (i32, i32) {
    %c0_i32 = arith.constant 0 : i32
    %c0_i32_0 = arith.constant 0 : i32
    %c0_i32_1 = arith.constant 0 : i32
    return %c0_i32, %c0_i32_0 : i32, i32
  }
  func.func @transform_5(%arg0: i32, %arg1: memref<1xi32, #tpu.memory_space<smem>>) -> (i32, i32) {
    %c0_i32 = arith.constant 0 : i32
    %c0_i32_0 = arith.constant 0 : i32
    return %arg0, %c0_i32 : i32, i32
  }
}

</mosaic_0001>

<bundles_post_ra>
// kernel: tpu_custom_call.1
= control target key start
LH: loop header
LB: loop body
LE: loop exit
PB: predicated region body
PF: predicated region fallthrough
CT: control target
= control target key end

     0   :  { %12 = vsyncpa [#allocation5], 0  ;;  %s453_s0 = inlined_call_operand.<no memory space> [shape: s32[1], index: 0, kind: input, shape index: {}]   ;;  %s454_s1 = inlined_call_operand.hbm [shape: f32[16,128], index: 1, kind: input, shape index: {}]   ;;  %s455_s2 = inlined_call_operand.hbm [shape: f32[128,128], index: 2, kind: input, shape index: {}]   ;;  %s456_s3 = inlined_call_operand.vmem [shape: f32[1,128], index: 3, kind: input, shape index: {}]   ;;  %s457_s4 = inlined_call_operand.vmem [shape: f32[1,128], index: 4, kind: input, shape index: {}]   ;;  %s458_s5 = inlined_call_operand.vmem [shape: f32[1,128], index: 5, kind: input, shape index: {}]   ;;  %s459_s6 = inlined_call_operand.hbm [shape: f32[16,128], index: 6, kind: output, shape index: {}]  }
   0x1   :  { %13 = vsyncpa [#allocation8], 0 }
   0x2   :  { %14 = vsyncpa [#allocation6], 0  ;;  %s19_s23 = sshll.u32 %s454_s1, 4  ;;  %s361_s24 = smov [#allocation4]   ;;  %s20_s23 = int_to_ptr.hbm [resolvable:$true] %s19_s23 }
   0x3   :  { %s21_s25 = sshll.u32 %s361_s24, 4  ;;  %s32_s28 = sshll.u32 %s455_s2, 4  ;;  %s22_s25 = int_to_ptr.vmem [resolvable:$true] %s21_s25  ;;  %s33_s28 = int_to_ptr.hbm [resolvable:$true] %s32_s28 }
   0x4   :  { %s362_s29 = smov 128   ;;  %s363_s30 = smov 8  }
   0x5   :  { %27 = dma.hbm_to_vmem [thread:$0]  %s20_s23, 256, %s22_s25, [#allocation5], %s362_s29, %s362_s29, %s363_s30  }
   0x6   :  { %s364_s7 = smov [#allocation7]  }
   0x7   :  { %s34_s8 = sshll.u32 %s364_s7, 4  ;;  %s35_s8 = int_to_ptr.vmem [resolvable:$true] %s34_s8 }
   0x8   :  { %40 = dma.hbm_to_vmem [thread:$0]  %s33_s28, 2048, %s35_s8, [#allocation8], %s362_s29, %s362_s29, %s363_s30  }
   0x9   :  { %355 = dma.done.wait [#allocation5], 256  }
   0xa   :  { %356 = vsyncadd [#allocation5], 4294967040 }
   0xb   :  { %357 = dma.done.wait [#allocation8], 2048  }
   0xc   :  { %358 = vsyncadd [#allocation8], 4294965248  ;;  %v415_v0 = vld [vmem:[#allocation4] sm:$0xff]  ;;  %v418_v1 = vld [vmem:[#allocation4 + $0x8] sm:$0xff]  ;;  %v365_v2 = vmov 128.0   ;;  %s367_s13 = smov [#allocation9]  }
   0xd   :  { %57 = vadd.xlane.f32.xlu0 %v415_v0  ;;  %273 = vrcp.f32 %v365_v2  ;;  %v165_v17 = vld [vmem:[#allocation7 + $0x70] sm:$0xff]  ;;  %v166_v18 = vld [vmem:[#allocation7 + $0x78] sm:$0xff]  ;;  %v163_v20 = vld [vmem:[#allocation7 + $0x60] sm:$0xff]  ;;  %s207_s12 = smul.u32 2654435769, %s453_s0  ;;  %s245_s14 = sshll.u32 %s367_s13, 4  ;;  %s246_s14 = int_to_ptr.vmem [resolvable:$true] %s245_s14 }
   0xe   :  { %v174_v19 = vpack.c.bf16 %v166_v18, %v165_v17  ;;  %v164_v21 = vld [vmem:[#allocation7 + $0x68] sm:$0xff]  ;;  %v161_v23 = vld [vmem:[#allocation7 + $0x50] sm:$0xff]  ;;  %v162_v24 = vld [vmem:[#allocation7 + $0x58] sm:$0xff] }
   0xf   :  { %v173_v22 = vpack.c.bf16 %v164_v21, %v163_v20  ;;  %v172_v26 = vpack.c.bf16 %v162_v24, %v161_v23  ;;  %v159_v28 = vld [vmem:[#allocation7 + $0x40] sm:$0xff]  ;;  %v160_v29 = vld [vmem:[#allocation7 + $0x48] sm:$0xff]  ;;  %v157_v31 = vld [vmem:[#allocation7 + $0x30] sm:$0xff] }
  0x10   :  { %179 = vmatpush.bf16.msra.mxu0 %v174_v19  ;;  %v171_v30 = vpack.c.bf16 %v160_v29, %v159_v28  ;;  %v158_v32 = vld [vmem:[#allocation7 + $0x38] sm:$0xff]  ;;  %v155_v37 = vld [vmem:[#allocation7 + $0x20] sm:$0xff]  ;;  %v156_v38 = vld [vmem:[#allocation7 + $0x28] sm:$0xff] }
  0x11   :  { %v170_v34 = vpack.c.bf16 %v158_v32, %v157_v31  ;;  %v169_v41 = vpack.c.bf16 %v156_v38, %v155_v37  ;;  %v153_v42 = vld [vmem:[#allocation7 + $0x10] sm:$0xff]  ;;  %v154_v43 = vld [vmem:[#allocation7 + $0x18] sm:$0xff]  ;;  %v151_v48 = vld [vmem:[#allocation7] sm:$0xff] }
  0x12   :  { %v168_v46 = vpack.c.bf16 %v154_v43, %v153_v42  ;;  %v152_v49 = vld [vmem:[#allocation7 + $0x8] sm:$0xff]  ;;  %v271_v31 = vld [vmem:[%s458_s5] ss:$0 sm:$0xff] }
  0x13   :  { %v274_v3 = vpop.eup %273  ;;  %v167_v54 = vpack.c.bf16 %v152_v49, %v151_v48 }
  0x14   :  { %v62_v4 = vmul.f32 128.0, %v274_v3  ;;  %vm66_vm0 = vweird.f32 %v274_v3  ;;  %180 = vmatpush.bf16.msra.mxu0 %v173_v22 }
  0x15   :  { %59 = vadd.xlane.f32.xlu0 %v418_v1 }
  0x16   :  { %v63_v5 = vsub.f32 1.0, %v62_v4 }
  0x18   :  { %v64_v6 = vmul.f32 %v274_v3, %v63_v5  ;;  %181 = vmatpush.bf16.msra.mxu0 %v172_v26 }
  0x1a   :  { %v65_v7 = vadd.f32 %v274_v3, %v64_v6 }
  0x1c   :  { %v67_v8 = vsel %vm66_vm0, %v274_v3, %v65_v7  ;;  %182 = vmatpush.bf16.msra.mxu0 %v171_v30 }
  0x20   :  { %183 = vmatpush.bf16.msra.mxu0 %v170_v34 }
  0x24   :  { %184 = vmatpush.bf16.msra.mxu0 %v169_v41 }
  0x28   :  { %185 = vmatpush.bf16.msra.mxu0 %v168_v46 }
  0x2c   :  { %186 = vmatpush.bf16.msra.mxu0 %v167_v54 }
  0x80   :  { %v58_v9 = vpop.xlane.xlu0 %57 }
  0x81   :  { %v68_v10 = vmul.f32 %v67_v8, %v58_v9 }
  0x83   :  { %v422_v11 = vsub.f32 %v415_v0, %v68_v10 }
  0x85   :  { %v72_v12 = vmul.f32 %v422_v11, %v422_v11 }
  0x87   :  { %74 = vadd.xlane.f32.xlu1 %v72_v12 }
  0x88   :  { %v60_v13 = vpop.xlane.xlu0 %59 }
  0x89   :  { %v69_v14 = vmul.f32 %v67_v8, %v60_v13 }
  0x8b   :  { %v427_v15 = vsub.f32 %v418_v1, %v69_v14 }
  0x8d   :  { %v73_v16 = vmul.f32 %v427_v15, %v427_v15 }
  0x8f   :  { %76 = vadd.xlane.f32.xlu1 %v73_v16 }
  0xfa   :  { %v75_v25 = vpop.xlane.xlu1 %74 }
  0xfb   :  { %v78_v27 = vmul.f32 0.007874016, %v75_v25  ;;  %v270_v25 = vld [vmem:[%s457_s4] ss:$0 sm:$0xff] }
  0xfd   :  { %275 = vrsqrt.f32 %v78_v27  ;;  %vm87_vm1 = vcmp.eq.f32.partialorder %v78_v27, inf  ;;  %v90_v55 = vand.u32 2147483648, %v78_v27  ;;  %vm89_vm2 = vcmp.eq.f32.partialorder %v78_v27, 0.0 }
 0x102   :  { %v77_v33 = vpop.xlane.xlu1 %76 }
 0x103   :  { %v276_v35 = vpop.eup %275  ;;  %v79_v36 = vmul.f32 0.007874016, %v77_v33 }
 0x104   :  { %v81_v39 = vmul.f32 %v276_v35, %v78_v27 }
 0x105   :  { %277 = vrsqrt.f32 %v79_v36  ;;  %vm99_vm3 = vcmp.eq.f32.partialorder %v79_v36, inf  ;;  %v102_v63 = vand.u32 2147483648, %v79_v36  ;;  %vm101_vm4 = vcmp.eq.f32.partialorder %v79_v36, 0.0 }
 0x106   :  { %v82_v40 = vmul.f32 %v276_v35, %v81_v39 }
 0x108   :  { %v83_v44 = vmul.f32 0.5, %v82_v40  ;;  %v208_v40 = vstv %s207_s12 }
 0x10a   :  { %v84_v45 = vsub.f32 1.5, %v83_v44 }
 0x10b   :  { %v278_v47 = vpop.eup %277 }
 0x10c   :  { %v85_v50 = vmul.f32 %v276_v35, %v84_v45  ;;  %v93_v51 = vmul.f32 %v278_v47, %v79_v36  ;;  %v193_v35 = vlaneseq }
 0x10e   :  { %v86_v52 = vmul.f32 %v85_v50, %v78_v27  ;;  %v94_v53 = vmul.f32 %v278_v47, %v93_v51  ;;  %v201_v37 = vand.u32 127, %v193_v35 }
 0x110   :  { %v88_v56 = vsel %vm87_vm1, %v78_v27, %v86_v52  ;;  %v95_v57 = vmul.f32 0.5, %v94_v53 }
 0x111   :  { %v91_v58 = vsel %vm89_vm2, %v90_v55, %v88_v56 }
 0x112   :  { %v96_v59 = vsub.f32 1.5, %v95_v57  ;;  %v104_v60 = vadd.f32 1e-06, %v91_v58 }
 0x114   :  { %v97_v61 = vmul.f32 %v278_v47, %v96_v59  ;;  %279 = vrcp.f32 %v104_v60  ;;  %v117_v9 = vand.u32 2147483648, %v104_v60  ;;  %vm111_vm6 = vweird.f32 %v104_v60 }
 0x115   :  { %v115_v12 = vand.u32 2147483647, %v104_v60 }
 0x116   :  { %v98_v62 = vmul.f32 %v97_v61, %v79_v36  ;;  %v118_v17 = vor.u32 1.1754944e-38, %v117_v9  ;;  %v272_v61 = vld [vmem:[%s456_s3] ss:$0 sm:$0xff]  ;;  %s247_s3 = sshll.u32 %s459_s6, 4  ;;  %s248_s3 = int_to_ptr.hbm [resolvable:$true] %s247_s3 }
 0x117   :  { %vm116_vm8 = vcmp.eq.f32.partialorder %v115_v12, 8.507059e+37 }
 0x118   :  { %v100_v2 = vsel %vm99_vm3, %v79_v36, %v98_v62  ;;  %v194_v36 = vshrl.u32 %v193_v35, 7 }
 0x119   :  { %v103_v3 = vsel %vm101_vm4, %v102_v63, %v100_v2  ;;  %v366_v2 = vmov 0.0  }
 0x11a   :  { %v280_v4 = vpop.eup %279  ;;  %v105_v5 = vadd.f32 1e-06, %v103_v3  ;;  %v202_v38 = vmul.u32 128, %v194_v36 }
 0x11b   :  { %v107_v6 = vmul.f32 %v280_v4, %v104_v60  ;;  %vm112_vm5 = vweird.f32 %v280_v4 }
 0x11c   :  { %281 = vrcp.f32 %v105_v5  ;;  %vm113_vm7 = vmor %vm111_vm6, %vm112_vm5  ;;  %v132_v20 = vand.u32 2147483648, %v105_v5  ;;  %v130_v22 = vand.u32 2147483647, %v105_v5  ;;  %vm126_vm10 = vweird.f32 %v105_v5 }
 0x11d   :  { %v108_v7 = vsub.f32 1.0, %v107_v6  ;;  %v204_v39 = vadd.s32 %v202_v38, %v201_v37 }
 0x11e   :  { %v133_v26 = vor.u32 1.1754944e-38, %v132_v20  ;;  %vm131_vm12 = vcmp.eq.f32.partialorder %v130_v22, 8.507059e+37 }
 0x11f   :  { %v109_v8 = vmul.f32 %v280_v4, %v108_v7  ;;  %v209_v41 = vxor.u32 %v208_v40, %v204_v39 }
 0x121   :  { %v110_v10 = vadd.f32 %v280_v4, %v109_v8  ;;  %v211_v43 = vshrl.u32 %v209_v41, 16 }
 0x122   :  { %v282_v13 = vpop.eup %281 }
 0x123   :  { %v114_v14 = vsel %vm113_vm7, %v280_v4, %v110_v10  ;;  %v122_v16 = vmul.f32 %v282_v13, %v105_v5  ;;  %vm127_vm9 = vweird.f32 %v282_v13  ;;  %v213_v45 = vxor.u32 %v211_v43, %v209_v41 }
 0x124   :  { %v119_v19 = vsel %vm116_vm8, %v118_v17, %v114_v14  ;;  %vm128_vm11 = vmor %vm126_vm10, %vm127_vm9 }
 0x125   :  { %v123_v18 = vsub.f32 1.0, %v122_v16  ;;  %v137_v24 = vmul.f32 %v119_v19, %v422_v11  ;;  %v215_v47 = vmul.u32 2246822507, %v213_v45 }
 0x127   :  { %v124_v21 = vmul.f32 %v282_v13, %v123_v18  ;;  %v142_v30 = vmul.f32 %v270_v25, %v137_v24  ;;  %v217_v49 = vshrl.u32 %v215_v47, 13 }
 0x129   :  { %v125_v23 = vadd.f32 %v282_v13, %v124_v21  ;;  %v148_v33 = vadd.f32 %v271_v31, %v142_v30  ;;  %v219_v51 = vxor.u32 %v217_v49, %v215_v47 }
 0x12b   :  { %v129_v27 = vsel %vm128_vm11, %v282_v13, %v125_v23  ;;  %v221_v53 = vmul.u32 3266489909, %v219_v51 }
 0x12c   :  { %v134_v28 = vsel %vm131_vm12, %v133_v26, %v129_v27 }
 0x12d   :  { %v138_v29 = vmul.f32 %v134_v28, %v427_v15  ;;  %v195_v15 = vadd.s32 8, %v194_v36  ;;  %v223_v55 = vshrl.u32 %v221_v53, 16 }
 0x12f   :  { %v143_v32 = vmul.f32 %v270_v25, %v138_v29  ;;  %v203_v42 = vmul.u32 128, %v195_v15  ;;  %v225_v57 = vxor.u32 %v223_v55, %v221_v53 }
 0x131   :  { %v149_v34 = vadd.f32 %v271_v31, %v143_v32  ;;  %v205_v44 = vadd.s32 %v203_v42, %v201_v37  ;;  %v261_v59 = vxor.u32 2147483648, %v225_v57 }
 0x133   :  { %v150_v11 = vpack.c.bf16 %v149_v34, %v148_v33  ;;  %v210_v46 = vxor.u32 %v208_v40, %v205_v44  ;;  %vm229_vm13 = vcmp.ge.s32.totalorder %v261_v59, 2576980378 }
 0x134   :  { %v233_v3 = vsel %vm229_vm13, 1.1111112, %v366_v2 }
 0x135   :  { %187 = vmatmul.bf16.vlgmr.msra.gmra.mxu0 %v150_v11  ;;  %v212_v48 = vshrl.u32 %v210_v46, 16 }
 0x137   :  { %v214_v50 = vxor.u32 %v212_v48, %v210_v46 }
 0x139   :  { %v216_v52 = vmul.u32 2246822507, %v214_v50 }
 0x13b   :  { %v218_v54 = vshrl.u32 %v216_v52, 13 }
 0x13d   :  { %v220_v56 = vxor.u32 %v218_v54, %v216_v52 }
 0x13f   :  { %v222_v58 = vmul.u32 3266489909, %v220_v56 }
 0x141   :  { %v224_v60 = vshrl.u32 %v222_v58, 16 }
 0x143   :  { %v226_v62 = vxor.u32 %v224_v60, %v222_v58 }
 0x145   :  { %v262_v5 = vxor.u32 2147483648, %v226_v62 }
 0x147   :  { %vm232_vm14 = vcmp.ge.s32.totalorder %v262_v5, 2576980378 }
 0x148   :  { %v234_v9 = vsel %vm232_vm14, 1.1111112, %v366_v2 }
 0x1b2   :  { %v188_v63 = vpop.f32.mrf.mxu0 }
 0x1b3   :  { %v189_v4 = vadd.f32 %v272_v61, %v188_v63 }
 0x1b5   :  { %v235_v6 = vmul.f32 %v233_v3, %v189_v4 }
 0x1b7   :  { %v237_v7 = vadd.f32 %v235_v6, %v415_v0 }
 0x1b9   :  { %239 = vst [vmem:[#allocation9] sm:$0xff] %v237_v7 }
 0x1ba   :  { %v190_v8 = vpop.f32.mrf.mxu0 }
 0x1bb   :  { %v191_v10 = vadd.f32 %v272_v61, %v190_v8 }
 0x1bd   :  { %v236_v12 = vmul.f32 %v234_v9, %v191_v10 }
 0x1bf   :  { %v238_v13 = vadd.f32 %v236_v12, %v418_v1 }
 0x1c1   :  { %240 = vst [vmem:[#allocation9 + $0x8] sm:$0xff] %v238_v13 }
 0x1c2   :  { %253 = dma.vmem_to_hbm [thread:$0]  %s246_s14, 256, %s248_s3, [#allocation6], %s362_s29, %s362_s29, %s363_s30  }
 0x1c3   :  { %359 = dma.done.wait [#allocation6], 256  }
 0x1c4   :  { %360 = vsyncadd [#allocation6], 4294967040 }
 0x1c5   :  { %258 = vsyncpa [#allocation5], 1 }
 0x1c6   :  { %259 = vsyncpa [#allocation8], 1 }
 0x1c7   :  { %260 = vsyncpa [#allocation6], 1 }

</bundles_post_ra>
